<compile_context>
chip_gen: v7x
topology: tpu7x:2x2x1
jax: 0.10.0
libtpu: 0.0.40
codegen_flags: <defaults>
</compile_context>

<pallas_src>
import math
import functools

import jax
import jax.numpy as jnp
from jax.experimental import pallas as pl
from jax.experimental.pallas import tpu as pltpu


def _round_up(x, m):
    return ((x + m - 1) // m) * m


# ---------------------------------------------------------------------------
# Stage 1: support = X @ W   (computed once; lane-dense out_features)
# ---------------------------------------------------------------------------
def _support_kernel(x_ref, w_ref, s_ref):
    s_ref[...] = jnp.dot(
        x_ref[...], w_ref[...], preferred_element_type=jnp.float32
    ).astype(s_ref.dtype)


# ---------------------------------------------------------------------------
# Stage 2: out = adj @ support (+ bias), tiled over (rows, contraction over N)
# ---------------------------------------------------------------------------
def _aggregate_bias_kernel(adj_ref, s_ref, b_ref, o_ref, acc_ref):
    k = pl.program_id(1)

    @pl.when(k == 0)
    def _():
        acc_ref[...] = jnp.zeros_like(acc_ref)

    acc_ref[...] += jnp.dot(
        adj_ref[...], s_ref[...], preferred_element_type=jnp.float32
    )

    @pl.when(k == pl.num_programs(1) - 1)
    def _():
        # Bias added once, in f32, only on the final contraction step.
        o_ref[...] = (acc_ref[...] + b_ref[...].astype(jnp.float32)).astype(
            o_ref.dtype
        )


def _aggregate_kernel(adj_ref, s_ref, o_ref, acc_ref):
    k = pl.program_id(1)

    @pl.when(k == 0)
    def _():
        acc_ref[...] = jnp.zeros_like(acc_ref)

    acc_ref[...] += jnp.dot(
        adj_ref[...], s_ref[...], preferred_element_type=jnp.float32
    )

    @pl.when(k == pl.num_programs(1) - 1)
    def _():
        o_ref[...] = acc_ref[...].astype(o_ref.dtype)


# ---------------------------------------------------------------------------
# Wrapper: GraphConvolution.forward
# ---------------------------------------------------------------------------
@functools.partial(jax.jit, static_argnames=("has_bias",))
def _graph_convolution_impl(x, weight, adj, bias, *, has_bias):
    n, in_f = x.shape
    out_f = weight.shape[1]

    # Compute dtype follows adj (the dominant HBM traffic). bf16 inputs feed
    # the MXU at native rate; accumulation is always f32.
    compute_dtype = adj.dtype

    # Lane-dense output / support feature dim (multiple of 128).
    f_p = _round_up(out_f, 128)

    # Contraction tile over N (adj lane dim): multiple of 128, capped at 512.
    bk = min(512, _round_up(n, 128))
    n_pk = _round_up(n, bk)
    # Row tile over N (adj sublane dim): multiple of 8, capped at 256
    # (fills the 256-wide MXU on v6e/v7x, safe for 64 MiB VMEM on v7x).
    bm = min(256, _round_up(n, 8))
    n_pm = _round_up(n, bm)
    # Row tile for the small support kernel (n_pk is a multiple of 128).
    bs = 128

    # Zero-pad to tile multiples (padded rows/cols contribute zeros; padded
    # output rows / feature columns are sliced off at the end).
    x_p = jnp.pad(x, ((0, n_pk - n), (0, 0))).astype(compute_dtype)
    w_p = jnp.pad(weight, ((0, 0), (0, f_p - out_f))).astype(compute_dtype)
    adj_p = jnp.pad(adj, ((0, n_pm - n), (0, n_pk - n)))

    # ---- Stage 1: support = X @ W (once, tiny relative to adj) -------------
    support = pl.pallas_call(
        _support_kernel,
        out_shape=jax.ShapeDtypeStruct((n_pk, f_p), compute_dtype),
        grid_spec=pltpu.PrefetchScalarGridSpec(
            num_scalar_prefetch=0,
            grid=(n_pk // bs,),
            in_specs=[
                pl.BlockSpec((bs, in_f), lambda i: (i, 0)),
                pl.BlockSpec((in_f, f_p), lambda i: (0, 0)),
            ],
            out_specs=pl.BlockSpec((bs, f_p), lambda i: (i, 0)),
        ),
        compiler_params=pltpu.CompilerParams(
            dimension_semantics=("parallel",)
        ),
    )(x_p, w_p)

    # ---- Stage 2: out = adj @ support (+ bias) ------------------------------
    in_specs = [
        pl.BlockSpec((bm, bk), lambda i, k: (i, k)),      # adj tile
        pl.BlockSpec((bk, f_p), lambda i, k: (k, 0)),     # support tile
    ]
    operands = [adj_p, support]
    if has_bias:
        b_p = jnp.pad(bias.reshape(1, out_f), ((0, 0), (0, f_p - out_f)))
        in_specs.append(pl.BlockSpec((1, f_p), lambda i, k: (0, 0)))
        operands.append(b_p)
        kernel = _aggregate_bias_kernel
    else:
        kernel = _aggregate_kernel

    itemsize = jnp.dtype(compute_dtype).itemsize
    cost = pl.CostEstimate(
        flops=2 * n * n * out_f + 2 * n * in_f * out_f,
        transcendentals=0,
        bytes_accessed=int(
            adj_p.size * itemsize           # dominant: adjacency read
            + support.size * itemsize       # support read
            + n_pm * f_p * 4                # output write (f32)
        ),
    )

    out_p = pl.pallas_call(
        kernel,
        out_shape=jax.ShapeDtypeStruct((n_pm, f_p), jnp.float32),
        grid_spec=pltpu.PrefetchScalarGridSpec(
            num_scalar_prefetch=0,
            grid=(n_pm // bm, n_pk // bk),   # reduction axis last
            in_specs=in_specs,
            out_specs=pl.BlockSpec((bm, f_p), lambda i, k: (i, 0)),
            scratch_shapes=[pltpu.VMEM((bm, f_p), jnp.float32)],
        ),
        compiler_params=pltpu.CompilerParams(
            dimension_semantics=("parallel", "arbitrary")
        ),
        cost_estimate=cost,
    )(*operands)

    return out_p[:n, :out_f]


def graph_convolution(x, weight, adj, bias=None):
    """x: [N, in_f], weight: [in_f, out_f], adj: [N, N] (dense), bias: [out_f] or None."""
    return _graph_convolution_impl(
        x, weight, adj,
        bias if bias is not None else jnp.zeros((weight.shape[1],), jnp.float32),
        has_bias=bias is not None,
    )


if __name__ == "__main__":
    key = jax.random.PRNGKey(0)

    def make_inputs(key, n, in_f, out_f):
        kx, kadj, kw, kb = jax.random.split(key, 4)
        x = jax.random.normal(kx, (n, in_f), dtype=jnp.float32)
        adj_raw = (jax.random.uniform(kadj, (n, n)) > 0.5).astype(jnp.float32)
        adj_raw = adj_raw + jnp.eye(n, dtype=jnp.float32)      # self loops
        adj = adj_raw / jnp.sum(adj_raw, axis=1, keepdims=True)
        stdv = 1.0 / math.sqrt(out_f)
        weight = jax.random.uniform(kw, (in_f, out_f), minval=-stdv, maxval=stdv,
                                    dtype=jnp.float32)
        bias = jax.random.uniform(kb, (out_f,), minval=-stdv, maxval=stdv,
                                  dtype=jnp.float32)
        # bf16 MXU operands (accumulation stays f32 inside the kernels).
        return (x.astype(jnp.bfloat16), adj.astype(jnp.bfloat16),
                weight.astype(jnp.bfloat16), bias)

    def reference(x, adj, weight, bias):
        x32 = x.astype(jnp.float32)
        w32 = weight.astype(jnp.float32)
        adj32 = adj.astype(jnp.float32)
        # Match kernel numerics: support rounded to bf16 between the two matmuls.
        s = (x32 @ w32).astype(jnp.bfloat16).astype(jnp.float32)
        out = adj32 @ s
        return out + bias[None, :] if bias is not None else out

    # --- small primary check (module-consistent shapes) ---------------------
    N, IN_F, OUT_F = 8, 16, 32
    k1, k2 = jax.random.split(key)
    x, adj, weight, bias = make_inputs(k1, N, IN_F, OUT_F)

    out = graph_convolution(x, weight, adj, bias)
    out = jax.block_until_ready(out)
    ref = reference(x, adj, weight, bias)
    assert out.shape == (N, OUT_F)
    assert out.dtype == jnp.float32
    assert jnp.allclose(out, ref, atol=1e-2, rtol=1e-2), "mismatch (small case)"

    # --- larger check: exercises multi-tile row grid + k-axis accumulation --
    N2 = 640
    x2, adj2, weight2, bias2 = make_inputs(k2, N2, IN_F, OUT_F)
    out2 = graph_convolution(x2, weight2, adj2, bias2)
    out2 = jax.block_until_ready(out2)
    ref2 = reference(x2, adj2, weight2, bias2)
    assert out2.shape == (N2, OUT_F)
    assert jnp.allclose(out2, ref2, atol=1e-2, rtol=1e-2), "mismatch (tiled case)"

    # --- bias=None path ------------------------------------------------------
    out3 = graph_convolution(x, weight, adj, None)
    out3 = jax.block_until_ready(out3)
    ref3 = reference(x, adj, weight, None)
    assert jnp.allclose(out3, ref3, atol=1e-2, rtol=1e-2), "mismatch (no-bias case)"

    print("KERNEL_OK")
</pallas_src>

<mosaic_0001>
module attributes {stable_mosaic.version = 11 : i64} {
  func.func @_support_kernel(%arg0: i32, %arg1: memref<128x16xbf16, #tpu.memory_space<vmem>>, %arg2: memref<16x128xbf16, #tpu.memory_space<vmem>>, %arg3: memref<128x128xbf16, #tpu.memory_space<vmem>>) attributes {dimension_semantics = [#tpu.dimension_semantics<parallel>], iteration_bounds = array<i64: 1>, scalar_prefetch = 0 : i64, scratch_operands = 0 : i64, tpu.core_type = #tpu.core_type<tc>, window_params = [{transform_indices = @transform_0, window_bounds = array<i64: 128, 16>}, {pipeline_mode = #tpu.pipeline_mode<synchronous>, transform_indices = @transform_1, window_bounds = array<i64: 16, 128>}, {transform_indices = @transform_2, window_bounds = array<i64: 128, 128>}]} {
    %c0 = arith.constant 0 : index
    %c0_0 = arith.constant 0 : index
    %0 = vector.load %arg1[%c0, %c0_0] : memref<128x16xbf16, #tpu.memory_space<vmem>>, vector<128x16xbf16>
    %c0_1 = arith.constant 0 : index
    %c0_2 = arith.constant 0 : index
    %1 = vector.load %arg2[%c0_1, %c0_2] : memref<16x128xbf16, #tpu.memory_space<vmem>>, vector<16x128xbf16>
    %cst = arith.constant dense<0.000000e+00> : vector<128x128xf32>
    %2 = tpu.matmul %0, %1, %cst {dimension_numbers = #tpu.dot_dimension_numbers<[1], [0], [0], [1], [0, 0, 1, 1], [], []>} : vector<128x16xbf16>, vector<16x128xbf16>, vector<128x128xf32> -> vector<128x128xf32>
    %3 = arith.truncf %2 : vector<128x128xf32> to vector<128x128xbf16>
    %c0_3 = arith.constant 0 : index
    %c0_4 = arith.constant 0 : index
    %4 = vector.load %arg3[%c0_3, %c0_4] : memref<128x128xbf16, #tpu.memory_space<vmem>>, vector<128x128xbf16>
    tpu.vector_store %arg3[%c0_3, %c0_4], %3 {strides = array<i32>} : memref<128x128xbf16, #tpu.memory_space<vmem>>, vector<128x128xbf16>,
    return
  }
  func.func @transform_0(%arg0: i32) -> (i32, i32) {
    %c0_i32 = arith.constant 0 : i32
    %c0_i32_0 = arith.constant 0 : i32
    return %arg0, %c0_i32 : i32, i32
  }
  func.func @transform_1(%arg0: i32) -> (i32, i32) {
    %c0_i32 = arith.constant 0 : i32
    %c0_i32_0 = arith.constant 0 : i32
    %c0_i32_1 = arith.constant 0 : i32
    return %c0_i32, %c0_i32_0 : i32, i32
  }
  func.func @transform_2(%arg0: i32) -> (i32, i32) {
    %c0_i32 = arith.constant 0 : i32
    %c0_i32_0 = arith.constant 0 : i32
    return %arg0, %c0_i32 : i32, i32
  }
}

module attributes {stable_mosaic.version = 11 : i64} {
  func.func @_aggregate_bias_kernel(%arg0: i32, %arg1: i32, %arg2: memref<8x128xbf16, #tpu.memory_space<vmem>>, %arg3: memref<128x128xbf16, #tpu.memory_space<vmem>>, %arg4: memref<1x128xf32, #tpu.memory_space<vmem>>, %arg5: memref<8x128xf32, #tpu.memory_space<vmem>>, %arg6: memref<8x128xf32, #tpu.memory_space<vmem>>) attributes {dimension_semantics = [#tpu.dimension_semantics<parallel>, #tpu.dimension_semantics<arbitrary>], iteration_bounds = array<i64: 1, 1>, scalar_prefetch = 0 : i64, scratch_operands = 1 : i64, tpu.core_type = #tpu.core_type<tc>, window_params = [{transform_indices = @transform_0, window_bounds = array<i64: 8, 128>}, {transform_indices = @transform_1, window_bounds = array<i64: 128, 128>}, {pipeline_mode = #tpu.pipeline_mode<synchronous>, transform_indices = @transform_2, window_bounds = array<i64: 1, 128>}, {transform_indices = @transform_3, window_bounds = array<i64: 8, 128>}]} {
    %c0_i32 = arith.constant 0 : i32
    %0 = arith.cmpi eq, %arg1, %c0_i32 : i32
    %1 = arith.extui %0 : i1 to i32
    %c0_i32_0 = arith.constant 0 : i32
    %2 = arith.cmpi ne, %1, %c0_i32_0 : i32
    scf.if %2 {
      %cst_10 = arith.constant 0.000000e+00 : f32
      %12 = vector.broadcast %cst_10 : f32 to vector<8x128xf32>
      %c0_11 = arith.constant 0 : index
      %c0_12 = arith.constant 0 : index
      %13 = vector.load %arg6[%c0_11, %c0_12] : memref<8x128xf32, #tpu.memory_space<vmem>>, vector<8x128xf32>
      tpu.vector_store %arg6[%c0_11, %c0_12], %12 {strides = array<i32>} : memref<8x128xf32, #tpu.memory_space<vmem>>, vector<8x128xf32>,
    } else {
    }
    %c0 = arith.constant 0 : index
    %c0_1 = arith.constant 0 : index
    %3 = vector.load %arg6[%c0, %c0_1] : memref<8x128xf32, #tpu.memory_space<vmem>>, vector<8x128xf32>
    %c0_2 = arith.constant 0 : index
    %c0_3 = arith.constant 0 : index
    %4 = vector.load %arg2[%c0_2, %c0_3] : memref<8x128xbf16, #tpu.memory_space<vmem>>, vector<8x128xbf16>
    %c0_4 = arith.constant 0 : index
    %c0_5 = arith.constant 0 : index
    %5 = vector.load %arg3[%c0_4, %c0_5] : memref<128x128xbf16, #tpu.memory_space<vmem>>, vector<128x128xbf16>
    %cst = arith.constant dense<0.000000e+00> : vector<8x128xf32>
    %6 = tpu.matmul %4, %5, %cst {dimension_numbers = #tpu.dot_dimension_numbers<[1], [0], [0], [1], [0, 0, 1, 1], [], []>} : vector<8x128xbf16>, vector<128x128xbf16>, vector<8x128xf32> -> vector<8x128xf32>
    %7 = arith.addf %3, %6 : vector<8x128xf32>
    %c0_6 = arith.constant 0 : index
    %c0_7 = arith.constant 0 : index
    %8 = vector.load %arg6[%c0_6, %c0_7] : memref<8x128xf32, #tpu.memory_space<vmem>>, vector<8x128xf32>
    tpu.vector_store %arg6[%c0_6, %c0_7], %7 {strides = array<i32>} : memref<8x128xf32, #tpu.memory_space<vmem>>, vector<8x128xf32>,
    %c0_i32_8 = arith.constant 0 : i32
    %9 = arith.cmpi eq, %arg1, %c0_i32_8 : i32
    %10 = arith.extui %9 : i1 to i32
    %c0_i32_9 = arith.constant 0 : i32
    %11 = arith.cmpi ne, %10, %c0_i32_9 : i32
    scf.if %11 {
      %c0_10 = arith.constant 0 : index
      %c0_11 = arith.constant 0 : index
      %12 = vector.load %arg6[%c0_10, %c0_11] : memref<8x128xf32, #tpu.memory_space<vmem>>, vector<8x128xf32>
      %c0_12 = arith.constant 0 : index
      %c0_13 = arith.constant 0 : index
      %13 = vector.load %arg4[%c0_12, %c0_13] : memref<1x128xf32, #tpu.memory_space<vmem>>, vector<1x128xf32>
      %14 = vector.broadcast %13 : vector<1x128xf32> to vector<8x128xf32>
      %15 = arith.addf %12, %14 : vector<8x128xf32>
      %c0_14 = arith.constant 0 : index
      %c0_15 = arith.constant 0 : index
      %16 = vector.load %arg5[%c0_14, %c0_15] : memref<8x128xf32, #tpu.memory_space<vmem>>, vector<8x128xf32>
      tpu.vector_store %arg5[%c0_14, %c0_15], %15 {strides = array<i32>} : memref<8x128xf32, #tpu.memory_space<vmem>>, vector<8x128xf32>,
    } else {
    }
    return
  }
  func.func @transform_0(%arg0: i32, %arg1: i32) -> (i32, i32) {
    %c0_i32 = arith.constant 0 : i32
    return %arg0, %arg1 : i32, i32
  }
  func.func @transform_1(%arg0: i32, %arg1: i32) -> (i32, i32) {
    %c0_i32 = arith.constant 0 : i32
    %c0_i32_0 = arith.constant 0 : i32
    return %arg1, %c0_i32 : i32, i32
  }
  func.func @transform_2(%arg0: i32, %arg1: i32) -> (i32, i32) {
    %c0_i32 = arith.constant 0 : i32
    %c0_i32_0 = arith.constant 0 : i32
    %c0_i32_1 = arith.constant 0 : i32
    return %c0_i32, %c0_i32_0 : i32, i32
  }
  func.func @transform_3(%arg0: i32, %arg1: i32) -> (i32, i32) {
    %c0_i32 = arith.constant 0 : i32
    %c0_i32_0 = arith.constant 0 : i32
    return %arg0, %c0_i32 : i32, i32
  }
}

</mosaic_0001>

<bundles_post_ra>
// kernel: _graph_convolution_impl.2
= control target key start
LH: loop header
LB: loop body
LE: loop exit
PB: predicated region body
PF: predicated region fallthrough
CT: control target
= control target key end

     0   :  { %vm76_vm0 = vcmask 130048   ;;  %s490_s1 = inlined_call_operand.vmem [shape: bf16[16,128], index: 1, kind: input, shape index: {}]   ;;  %s491_s0 = inlined_call_operand.vmem [shape: bf16[128,16], index: 0, kind: input, shape index: {}]   ;;  %s492_s2 = inlined_call_operand.vmem [shape: bf16[128,128], index: 2, kind: output, shape index: {}]  }
   0x1   :  { %v407_v0 = vld [vmem:[%s490_s1] sm:$0xff]   ;;  %v410_v3 = vld [vmem:[%s491_s0 + $0x8] sm:$0xff]   ;;  %v412_v5 = vld [vmem:[%s491_s0 + $0x10] sm:$0xff]  }
   0x2   :  { %v408_v1 = vld [vmem:[%s491_s0] sm:$0xff]   ;;  %387 = vmatprep.subr.bf16.mxu0 %v407_v0  ;;  %405 = vmatprep.subr.bf16.mxu1 %v407_v0  ;;  %v411_v4 = vld [vmem:[%s491_s0 + $0x28] sm:$0xff]   ;;  %v413_v6 = vld [vmem:[%s491_s0 + $0x30] sm:$0xff]  }
   0x3   :  { %v409_v2 = vld [vmem:[%s491_s0 + $0x20] sm:$0xff]   ;;  %388 = vmatpush3.bf16.msra.mxu0 %v407_v0  ;;  %406 = vmatpush3.bf16.msra.mxu1 %v407_v0  ;;  %v414_v7 = vld [vmem:[%s491_s0 + $0x18] sm:$0xff]  }
   0x4   :  { %389 = vmatprep.mubr.msk.bf16.mxu0 %vm76_vm0, %v408_v1  ;;  %397 = vmatprep.mubr.msk.bf16.mxu1 %vm76_vm0, %v409_v2  ;;  %v415_v8 = vld [vmem:[%s491_s0 + $0x38] sm:$0xff]  }
   0x6   :  { %390 = vmatmul.mubr.msk.bf16.vlgmr.msra.gmra.mrb[0].mxu0 %vm76_vm0, %v410_v3  ;;  %398 = vmatmul.mubr.msk.bf16.vlgmr.msra.gmra.mrb[0].mxu1 %vm76_vm0, %v411_v4 }
   0x7   :  { %393 = vmatprep.mubr.msk.bf16.mxu0 %vm76_vm0, %v412_v5  ;;  %401 = vmatprep.mubr.msk.bf16.mxu1 %vm76_vm0, %v413_v6 }
   0xe   :  { %394 = vmatmul.mubr.msk.bf16.gmra.mrb[4].mxu0 %vm76_vm0, %v414_v7  ;;  %402 = vmatmul.mubr.msk.bf16.gmra.mrb[4].mxu1 %vm76_vm0, %v415_v8 }
  0xd9   :  { %v391_v9 = vpop.f32.mrb[0].mxu0  ;;  %v399_v10 = vpop.f32.mrb[0].mxu1 }
  0xda   :  { %v135_v11 = vpop.f32.mrb[1].mxu0  ;;  %v167_v12 = vpop.f32.mrb[1].mxu1 }
  0xdb   :  { %v392_v13 = vpop.f32.mrb[2].mxu0  ;;  %v400_v14 = vpop.f32.mrb[2].mxu1 }
  0xdc   :  { %v339_v15 = vpack.c.bf16 %v392_v13, %v391_v9  ;;  %v359_v16 = vpack.c.bf16 %v400_v14, %v399_v10  ;;  %v138_v17 = vpop.f32.mrb[3].mxu0  ;;  %v170_v18 = vpop.f32.mrb[3].mxu1 }
  0xdd   :  { %v334_v19 = vpack.c.bf16 %v138_v17, %v135_v11  ;;  %v354_v20 = vpack.c.bf16 %v170_v18, %v167_v12 }
  0xde   :  { %371 = vst [vmem:[%s492_s2 + $0x8] sm:$0xff] %v339_v15   ;;  %375 = vst [vmem:[%s492_s2 + $0x28] sm:$0xff] %v359_v16  }
  0xdf   :  { %335 = vst [vmem:[%s492_s2] sm:$0xff] %v334_v19   ;;  %374 = vst [vmem:[%s492_s2 + $0x20] sm:$0xff] %v354_v20  }
  0xe1   :  { %v395_v21 = vpop.f32.mrb[4].mxu0  ;;  %v403_v22 = vpop.f32.mrb[4].mxu1 }
  0xe2   :  { %v151_v23 = vpop.f32.mrb[5].mxu0  ;;  %v183_v24 = vpop.f32.mrb[5].mxu1 }
  0xe3   :  { %v396_v25 = vpop.f32.mrb[6].mxu0  ;;  %v404_v26 = vpop.f32.mrb[6].mxu1 }
  0xe4   :  { %v349_v27 = vpack.c.bf16 %v396_v25, %v395_v21  ;;  %v369_v28 = vpack.c.bf16 %v404_v26, %v403_v22  ;;  %v154_v29 = vpop.f32.mrb[7].mxu0  ;;  %v186_v30 = vpop.f32.mrb[7].mxu1 }
  0xe5   :  { %v344_v31 = vpack.c.bf16 %v154_v29, %v151_v23  ;;  %v364_v32 = vpack.c.bf16 %v186_v30, %v183_v24 }
  0xe6   :  { %373 = vst [vmem:[%s492_s2 + $0x18] sm:$0xff] %v349_v27   ;;  %377 = vst [vmem:[%s492_s2 + $0x38] sm:$0xff] %v369_v28  }
  0xe7   :  { %372 = vst [vmem:[%s492_s2 + $0x10] sm:$0xff] %v344_v31   ;;  %376 = vst [vmem:[%s492_s2 + $0x30] sm:$0xff] %v364_v32  }

// kernel: _graph_convolution_impl.3
= control target key start
LH: loop header
LB: loop body
LE: loop exit
PB: predicated region body
PF: predicated region fallthrough
CT: control target
= control target key end

     0   :  { %v229_v1 = vmov 0.0   ;;  %vm230_vm0 = vmmov 0   ;;  %s294_s0 = inlined_call_operand.vmem [shape: bf16[8,128], index: 0, kind: input, shape index: {}]   ;;  %s295_s1 = inlined_call_operand.vmem [shape: bf16[128,128], index: 1, kind: input, shape index: {}]   ;;  %s296_s2 = inlined_call_operand.vmem [shape: f32[1,128], index: 2, kind: input, shape index: {}]   ;;  %s297_s3 = inlined_call_operand.hbm [shape: f32[8,128], index: 3, kind: output, shape index: {}]  }
   0x1   :  { %v197_v0 = vld [vmem:[%s295_s1] sm:$0xff]   ;;  %174 = vmatprep.subr.bf16.mxu0 %v229_v1  ;;  %v198_v2 = vld [vmem:[%s295_s1 + $0x8] sm:$0xff]   ;;  %190 = vmatprep.mubr.msk.bf16.mxu0 %vm230_vm0, %v229_v1  ;;  %v199_v3 = vld [vmem:[%s295_s1 + $0x10] sm:$0xff]  }
   0x2   :  { %175 = vmatpush3.bf16.msra.mxu0 %v197_v0 }
   0x3   :  { %176 = vmatprep.subr.bf16.mxu0 %v229_v1 }
   0x6   :  { %177 = vmatpush3.bf16.msra.mxu0 %v198_v2 }
   0x7   :  { %178 = vmatprep.subr.bf16.mxu0 %v229_v1 }
   0x8   :  { %8 = vsyncpa [#allocation4], 0  ;;  %v200_v4 = vld [vmem:[%s295_s1 + $0x18] sm:$0xff]   ;;  %v201_v5 = vld [vmem:[%s295_s1 + $0x20] sm:$0xff]   ;;  %s231_s5 = smov [#allocation3]  }
   0x9   :  { %v202_v6 = vld [vmem:[%s295_s1 + $0x28] sm:$0xff]   ;;  %v203_v7 = vld [vmem:[%s295_s1 + $0x30] sm:$0xff]   ;;  %v204_v8 = vld [vmem:[%s295_s1 + $0x38] sm:$0xff]   ;;  %s148_s6 = sshll.u32 %s231_s5, 4  ;;  %s149_s6 = int_to_ptr.vmem [resolvable:$true] %s148_s6 }
   0xa   :  { %179 = vmatpush3.bf16.msra.mxu0 %v199_v3  ;;  %v22_v9 = vld [vmem:[%s294_s0] sm:$0xf]  ;;  %s205_s1 = scalar_lea.vmem %s149_s6, 128  ;;  %p210_p1 = scmp.lt.s32.totalorder %s149_s6, %s149_s6 }
   0xb   :  { %180 = vmatprep.subr.bf16.mxu0 %v229_v1  ;;  %v164_v10 = vld [vmem:[%s296_s2] ss:$0 sm:$0xff]  ;;  %p206_p0 = scmp.ne.s32.totalorder %s149_s6, %s205_s1  ;;  %p211_p2 = scmp.lt.s32.totalorder %s205_s1, %s205_s1 }
   0xd   :  { %p212_p3 = por %p211_p2, %p210_p1 }
   0xe   :  { %181 = vmatpush3.bf16.msra.mxu0 %v200_v4 }
   0xf   :  { %182 = vmatprep.subr.bf16.mxu0 %v229_v1  ;;  %p213_p4 = pnand %p212_p3, %p206_p0 }
  0x12   :  { %183 = vmatpush3.bf16.msra.mxu0 %v201_v5 }
  0x13   :  { %184 = vmatprep.subr.bf16.mxu0 %v229_v1 }
  0x16   :  { %185 = vmatpush3.bf16.msra.mxu0 %v202_v6 }
  0x17   :  { %186 = vmatprep.subr.bf16.mxu0 %v229_v1 }
  0x1a   :  { %187 = vmatpush3.bf16.msra.mxu0 %v203_v7 }
  0x1b   :  { %188 = vmatprep.subr.bf16.mxu0 %v229_v1 }
  0x1e   :  { %189 = vmatpush3.bf16.msra.mxu0 %v204_v8 }
  0x21   :  { %191 = vmatmul.mubr.bf16.vlgmr.msra.gmra.mrb[0].mxu0 %v22_v9 }
  0xf4   :  { %v121_v11 = vpop.f32.mrb[0].mxu0 }
  0xf5   :  { %v140_v12 = vadd.f32 %v164_v10, %v121_v11  ;;  %v192_v13 = vpop.f32.mrb[1].mxu0 }
  0xf6   :  { %v124_v14 = vpop.f32.mrb[2].mxu0 }
  0xf7   :  { %141 = vst [vmem:[#allocation3] sm:$0xff] %v140_v12  ;;  %v193_v15 = vpop.f32.mrb[3].mxu0 }
  0xf8   :  { %216 = shalt.err (!%p213_p4)
}
  0xf9   :  { %s217_s2 = scalar_lea.hbm %s297_s3, 128 }
  0xfa   :  { %p218_p5 = scmp.ne.s32.totalorder %s297_s3, %s217_s2  ;;  %p221_p6 = scmp.lt.u32.totalorder %s217_s2, %s297_s3 }
  0xfc   :  { %p223_p7 = pnand %p221_p6, %p218_p5 }
  0xfe   :  { %226 = shalt.err (!%p223_p7)
}
  0xff   :  { %151 = dma.vmem_to_hbm [thread:$0]  %s149_s6, 128, %s297_s3, [#allocation4]  }
 0x100   :  { %227 = dma.done.wait [#allocation4], 128  }
 0x101   :  { %228 = vsyncadd [#allocation4], 4294967168 }
 0x102   :  { %155 = vsyncpa [#allocation4], 1 }

</bundles_post_ra>
